<compile_context>
chip_gen: v6e
topology: v6e:2x2x1
jax: 0.10.0
libtpu: 0.0.40
codegen_flags: <defaults>
</compile_context>

<pallas_src>
import functools

import jax
import jax.numpy as jnp
from jax.experimental import pallas as pl
from jax.experimental.pallas import tpu as pltpu


def _round_up(x, m):
    return ((x + m - 1) // m) * m


def linear_kernel(x_ref, w_ref, b_ref, o_ref):
    # (TM, K) x (K, 128) on the MXU, f32 accumulate; bias add + narrow store on VPU.
    acc = jnp.dot(x_ref[...], w_ref[...], preferred_element_type=jnp.float32)
    n = o_ref.shape[-1]
    o_ref[...] = (acc[:, :n] + b_ref[...]).astype(o_ref.dtype)


@functools.partial(jax.jit, static_argnames=("tm", "min_pallas_rows"))
def mlp_forward(x, w_padded, b, *, tm=2048, min_pallas_rows=256):
    """Pallas equivalent of MLP.forward.

    x        : (B, K)       f32 or bf16 (read as-is; no wrapper cast)
    w_padded : (K, NP)      weight, transposed + lane-padded to NP=128 at init
    b        : (1, N)       bias (unpadded)
    returns  : (B, N)       f32
    """
    B, K = x.shape
    Kw, NP = w_padded.shape
    n_out = b.shape[1]
    assert Kw == K and NP >= n_out

    # Tiny batch: one sub-microsecond matmul -> let XLA fuse it, skip kernel overhead.
    if B < min_pallas_rows:
        return (x @ w_padded[:, :n_out].astype(x.dtype)
                ).astype(jnp.float32) + b

    # Weight/bias are tiny and VMEM-resident; match W dtype to x for the MXU.
    w_use = w_padded if w_padded.dtype == x.dtype else w_padded.astype(x.dtype)

    # --- batch tile: multiple of 8 (f32 sublane granule), >=2 grid steps if possible,
    #     capped so double-buffered tiles stay well inside every chip's VMEM budget ---
    tm_req = min(_round_up(max(int(tm), 8), 8), 4096)
    half_b = _round_up(pl.cdiv(B, 2), 8)
    tm_eff = max(8, min(tm_req, half_b))
    grid = (pl.cdiv(B, tm_eff),)

    # Scoped-VMEM request: double-buffered x + resident W + double-buffered narrow out.
    itemsize = x.dtype.itemsize
    need = (2 * tm_eff * K * itemsize
            + K * NP * itemsize
            + 2 * tm_eff * n_out * 4
            + NP * 4)
    vmem_limit = int(min(max(need + (4 << 20), 32 << 20), 56 << 20))

    return pl.pallas_call(
        linear_kernel,
        out_shape=jax.ShapeDtypeStruct((B, n_out), jnp.float32),
        grid=grid,
        in_specs=[
            # x: one (TM, K) row tile per grid step (ragged last tile handled by Pallas).
            pl.BlockSpec((tm_eff, K), lambda i: (i, 0)),
            # W: replicated block -> DMA'd once, resident across the grid.
            pl.BlockSpec((K, NP), lambda i: (0, 0)),
            # bias: replicated, unpadded (last dim == full array dim).
            pl.BlockSpec((1, n_out), lambda i: (0, 0)),
        ],
        # Narrow output block: masked stores, but only 12 B/row vs 3072 B/row of x read.
        out_specs=pl.BlockSpec((tm_eff, n_out), lambda i: (i, 0)),
        compiler_params=pltpu.CompilerParams(
            dimension_semantics=("parallel",),   # rows independent -> shard on v7x TCs
            vmem_limit_bytes=vmem_limit,
        ),
    )(x, w_use, b)


def prepare_linear_params(weight, bias, lane_pad=128):
    """One-time host-side prep (hoisted out of the per-call path).

    weight : (N, K) PyTorch nn.Linear layout  -> returns (K, lane_pad) transposed+padded
    bias   : (N,)                             -> returns (1, N)
    """
    n, k = weight.shape
    w_t = jnp.transpose(weight)                                   # (K, N)
    npad = max(lane_pad, _round_up(n, lane_pad))
    w_p = jnp.pad(w_t, ((0, 0), (0, npad - n)))                   # zero lane-pad
    return w_p, bias.reshape(1, n)


def init_mlp_params(key, input_size=768, target_size=3):
    """Deterministic init mirroring nn.Linear default (uniform +/- 1/sqrt(fan_in))."""
    kw, kb = jax.random.split(key)
    bound = 1.0 / jnp.sqrt(jnp.float32(input_size))
    weight = jax.random.uniform(kw, (target_size, input_size), jnp.float32,
                                minval=-bound, maxval=bound)      # PyTorch (N, K)
    bias = jax.random.uniform(kb, (target_size,), jnp.float32,
                              minval=-bound, maxval=bound)
    return weight, bias


if __name__ == "__main__":
    key = jax.random.PRNGKey(0)
    k_x, k_p = jax.random.split(key)

    batch, input_size, target_size = 8, 768, 3

    x = jax.random.normal(k_x, (batch, input_size), jnp.float32)
    weight, bias = init_mlp_params(k_p, input_size=input_size, target_size=target_size)
    w_p, b2 = prepare_linear_params(weight, bias)
    ref_small = x @ weight.T + bias

    # 1) Force the Pallas path even at this tiny batch (smoke test of the kernel).
    out = jax.block_until_ready(mlp_forward(x, w_p, b2, tm=64, min_pallas_rows=0))
    assert out.shape == (batch, target_size)
    assert jnp.allclose(out, ref_small, atol=1e-4, rtol=1e-4)

    # 2) Multi-step grid with a ragged last tile (B=1000 not a multiple of the tile).
    xb = jax.random.normal(k_x, (1000, input_size), jnp.float32)
    outb = jax.block_until_ready(mlp_forward(xb, w_p, b2, tm=512))
    refb = xb @ weight.T + bias
    assert outb.shape == (1000, target_size)
    assert jnp.allclose(outb, refb, atol=1e-4, rtol=1e-4)

    # 3) Default call at tiny batch exercises the small-batch XLA fallback.
    outs = jax.block_until_ready(mlp_forward(x, w_p, b2))
    assert jnp.allclose(outs, ref_small, atol=1e-4, rtol=1e-4)

    print("KERNEL_OK")
</pallas_src>

<mosaic_0001>
module attributes {stable_mosaic.version = 11 : i64} {
  func.func @linear_kernel(%arg0: i32, %arg1: memref<8x768xf32, #tpu.memory_space<vmem>>, %arg2: memref<768x128xf32, #tpu.memory_space<vmem>>, %arg3: memref<1x3xf32, #tpu.memory_space<vmem>>, %arg4: memref<8x3xf32, #tpu.memory_space<vmem>>) attributes {dimension_semantics = [#tpu.dimension_semantics<parallel>], iteration_bounds = array<i64: 1>, scalar_prefetch = 0 : i64, scratch_operands = 0 : i64, tpu.core_type = #tpu.core_type<tc>, window_params = [{transform_indices = @transform_0, window_bounds = array<i64: 8, 768>}, {pipeline_mode = #tpu.pipeline_mode<synchronous>, transform_indices = @transform_1, window_bounds = array<i64: 768, 128>}, {pipeline_mode = #tpu.pipeline_mode<synchronous>, transform_indices = @transform_2, window_bounds = array<i64: 1, 3>}, {transform_indices = @transform_3, window_bounds = array<i64: 8, 3>}]} {
    %c0 = arith.constant 0 : index
    %c0_0 = arith.constant 0 : index
    %0 = vector.load %arg1[%c0, %c0_0] : memref<8x768xf32, #tpu.memory_space<vmem>>, vector<8x768xf32>
    %c0_1 = arith.constant 0 : index
    %c0_2 = arith.constant 0 : index
    %1 = vector.load %arg2[%c0_1, %c0_2] : memref<768x128xf32, #tpu.memory_space<vmem>>, vector<768x128xf32>
    %cst = arith.constant dense<0.000000e+00> : vector<8x128xf32>
    %2 = tpu.matmul %0, %1, %cst {dimension_numbers = #tpu.dot_dimension_numbers<[1], [0], [0], [1], [0, 0, 1, 1], [], []>} : vector<8x768xf32>, vector<768x128xf32>, vector<8x128xf32> -> vector<8x128xf32>
    %3 = vector.extract_strided_slice %2 {offsets = [0, 0], sizes = [8, 3], strides = [1, 1]} : vector<8x128xf32> to vector<8x3xf32>
    %c0_3 = arith.constant 0 : index
    %c0_4 = arith.constant 0 : index
    %4 = vector.load %arg3[%c0_3, %c0_4] : memref<1x3xf32, #tpu.memory_space<vmem>>, vector<1x3xf32>
    %5 = vector.broadcast %4 : vector<1x3xf32> to vector<8x3xf32>
    %6 = arith.addf %3, %5 : vector<8x3xf32>
    %c0_5 = arith.constant 0 : index
    %c0_6 = arith.constant 0 : index
    %7 = vector.load %arg4[%c0_5, %c0_6] : memref<8x3xf32, #tpu.memory_space<vmem>>, vector<8x3xf32>
    tpu.vector_store %arg4[%c0_5, %c0_6], %6 {strides = array<i32>} : memref<8x3xf32, #tpu.memory_space<vmem>>, vector<8x3xf32>,
    return
  }
  func.func @transform_0(%arg0: i32) -> (i32, i32) {
    %c0_i32 = arith.constant 0 : i32
    %c0_i32_0 = arith.constant 0 : i32
    return %arg0, %c0_i32 : i32, i32
  }
  func.func @transform_1(%arg0: i32) -> (i32, i32) {
    %c0_i32 = arith.constant 0 : i32
    %c0_i32_0 = arith.constant 0 : i32
    %c0_i32_1 = arith.constant 0 : i32
    return %c0_i32, %c0_i32_0 : i32, i32
  }
  func.func @transform_2(%arg0: i32) -> (i32, i32) {
    %c0_i32 = arith.constant 0 : i32
    %c0_i32_0 = arith.constant 0 : i32
    %c0_i32_1 = arith.constant 0 : i32
    return %c0_i32, %c0_i32_0 : i32, i32
  }
  func.func @transform_3(%arg0: i32) -> (i32, i32) {
    %c0_i32 = arith.constant 0 : i32
    %c0_i32_0 = arith.constant 0 : i32
    return %arg0, %c0_i32 : i32, i32
  }
}

</mosaic_0001>

<bundles_post_ra>
// kernel: mlp_forward.1
= control target key start
LH: loop header
LB: loop body
LE: loop exit
PB: predicated region body
PF: predicated region fallthrough
CT: control target
= control target key end

     0   :  { %8 = vsyncpa [#allocation3], 0  ;;  %s558_s0 = inlined_call_operand.hbm [shape: f32[8,768], index: 0, kind: input, shape index: {}]   ;;  %s559_s1 = inlined_call_operand.hbm [shape: f32[768,128], index: 1, kind: input, shape index: {}]   ;;  %s560_s2 = inlined_call_operand.vmem [shape: f32[1,3], index: 2, kind: input, shape index: {}]   ;;  %s561_s3 = inlined_call_operand.vmem [shape: f32[8,3], index: 3, kind: output, shape index: {}]  }
   0x1   :  { %9 = vsyncpa [#allocation5], 0  ;;  %s522_s12 = smov [#allocation2]   ;;  %s523_s14 = smov [#allocation4]  }
   0x2   :  { %s16_s13 = sshll.u32 %s522_s12, 4  ;;  %s25_s15 = sshll.u32 %s523_s14, 4  ;;  %s17_s13 = int_to_ptr.vmem [resolvable:$true] %s16_s13  ;;  %s26_s15 = int_to_ptr.vmem [resolvable:$true] %s25_s15 }
   0x3   :  { %s486_s16 = scalar_lea.vmem %s17_s13, 768  ;;  %p491_p1 = scmp.lt.s32.totalorder %s17_s13, %s17_s13 }
   0x4   :  { %p487_p0 = scmp.ne.s32.totalorder %s17_s13, %s486_s16  ;;  %p492_p2 = scmp.lt.s32.totalorder %s486_s16, %s486_s16 }
   0x6   :  { %p493_p3 = por %p492_p2, %p491_p1 }
   0x8   :  { %p494_p4 = pnand %p493_p3, %p487_p0 }
   0xa   :  { %497 = shalt.err (!%p494_p4)
}
   0xb   :  { %19 = dma.hbm_to_vmem [thread:$0]  %s558_s0, 768, %s17_s13, [#allocation3]  }
   0xc   :  { %s506_s19 = scalar_lea.vmem %s26_s15, 12288  ;;  %p511_p6 = scmp.lt.s32.totalorder %s26_s15, %s26_s15 }
   0xd   :  { %p507_p5 = scmp.ne.s32.totalorder %s26_s15, %s506_s19  ;;  %p512_p7 = scmp.lt.s32.totalorder %s506_s19, %s506_s19 }
   0xf   :  { %p513_p8 = por %p512_p7, %p511_p6 }
  0x11   :  { %p514_p9 = pnand %p513_p8, %p507_p5 }
  0x13   :  { %517 = shalt.err (!%p514_p9)
}
  0x14   :  { %s524_s20 = smov 128   ;;  %s525_s21 = smov 8  }
  0x15   :  { %31 = dma.hbm_to_vmem [thread:$0]  %s559_s1, 12288, %s26_s15, [#allocation5], %s524_s20, %s524_s20, %s525_s21  }
  0x16   :  { %518 = dma.done.wait [#allocation3], 768  }
  0x17   :  { %519 = vsyncadd [#allocation3], 4294966528 }
  0x18   :  { %520 = dma.done.wait [#allocation5], 12288  }
  0x19   :  { %521 = vsyncadd [#allocation5], 4294955008  ;;  %v77_v0 = vld [vmem:[#allocation4 + $0xf8] sm:$0xff]  ;;  %v76_v4 = vld [vmem:[#allocation4 + $0xf0] sm:$0xff]  ;;  %vm360_vm0 = vcmask 23552  }
  0x1a   :  { %v109_v1 = vld [vmem:[#allocation4 + $0x1f8] sm:$0xff]  ;;  %369 = vmatprep.subr.mxu0 %v77_v0  ;;  %v108_v5 = vld [vmem:[#allocation4 + $0x1f0] sm:$0xff]  ;;  %v75_v8 = vld [vmem:[#allocation4 + $0xe8] sm:$0xff] }
  0x1b   :  { %v61_v2 = vld [vmem:[#allocation4 + $0x78] sm:$0xff]  ;;  %404 = vmatprep.subr.mxu1 %v109_v1  ;;  %v60_v6 = vld [vmem:[#allocation4 + $0x70] sm:$0xff]  ;;  %v107_v9 = vld [vmem:[#allocation4 + $0x1e8] sm:$0xff] }
  0x1c   :  { %v93_v3 = vld [vmem:[#allocation4 + $0x178] sm:$0xff]  ;;  %370 = vmatpush3.msra.mxu0 %v61_v2  ;;  %v92_v7 = vld [vmem:[#allocation4 + $0x170] sm:$0xff]  ;;  %v59_v10 = vld [vmem:[#allocation4 + $0x68] sm:$0xff] }
  0x1d   :  { %405 = vmatpush3.msra.mxu1 %v93_v3  ;;  %371 = vmatprep.subr.mxu0 %v76_v4  ;;  %v91_v11 = vld [vmem:[#allocation4 + $0x168] sm:$0xff]  ;;  %v74_v12 = vld [vmem:[#allocation4 + $0xe0] sm:$0xff]  ;;  %v73_v16 = vld [vmem:[#allocation4 + $0xd8] sm:$0xff] }
  0x1e   :  { %406 = vmatprep.subr.mxu1 %v108_v5  ;;  %372 = vmatpush3.msra.mxu0 %v60_v6  ;;  %v106_v13 = vld [vmem:[#allocation4 + $0x1e0] sm:$0xff]  ;;  %v105_v17 = vld [vmem:[#allocation4 + $0x1d8] sm:$0xff]  ;;  %v72_v20 = vld [vmem:[#allocation4 + $0xd0] sm:$0xff] }
  0x1f   :  { %407 = vmatpush3.msra.mxu1 %v92_v7  ;;  %373 = vmatprep.subr.mxu0 %v75_v8  ;;  %v58_v14 = vld [vmem:[#allocation4 + $0x60] sm:$0xff]  ;;  %v57_v18 = vld [vmem:[#allocation4 + $0x58] sm:$0xff]  ;;  %v104_v21 = vld [vmem:[#allocation4 + $0x1d0] sm:$0xff] }
  0x20   :  { %408 = vmatprep.subr.mxu1 %v107_v9  ;;  %v90_v15 = vld [vmem:[#allocation4 + $0x160] sm:$0xff]  ;;  %374 = vmatpush3.msra.mxu0 %v59_v10  ;;  %v89_v19 = vld [vmem:[#allocation4 + $0x158] sm:$0xff]  ;;  %v56_v22 = vld [vmem:[#allocation4 + $0x50] sm:$0xff] }
  0x21   :  { %409 = vmatpush3.msra.mxu1 %v91_v11  ;;  %375 = vmatprep.subr.mxu0 %v74_v12  ;;  %v88_v23 = vld [vmem:[#allocation4 + $0x150] sm:$0xff]  ;;  %v71_v24 = vld [vmem:[#allocation4 + $0xc8] sm:$0xff]  ;;  %v70_v28 = vld [vmem:[#allocation4 + $0xc0] sm:$0xff] }
  0x22   :  { %410 = vmatprep.subr.mxu1 %v106_v13  ;;  %376 = vmatpush3.msra.mxu0 %v58_v14  ;;  %v103_v25 = vld [vmem:[#allocation4 + $0x1c8] sm:$0xff]  ;;  %v102_v29 = vld [vmem:[#allocation4 + $0x1c0] sm:$0xff]  ;;  %v69_v32 = vld [vmem:[#allocation4 + $0xb8] sm:$0xff] }
  0x23   :  { %411 = vmatpush3.msra.mxu1 %v90_v15  ;;  %377 = vmatprep.subr.mxu0 %v73_v16  ;;  %v55_v26 = vld [vmem:[#allocation4 + $0x48] sm:$0xff]  ;;  %v54_v30 = vld [vmem:[#allocation4 + $0x40] sm:$0xff]  ;;  %v101_v33 = vld [vmem:[#allocation4 + $0x1b8] sm:$0xff] }
  0x24   :  { %412 = vmatprep.subr.mxu1 %v105_v17  ;;  %378 = vmatpush3.msra.mxu0 %v57_v18  ;;  %v87_v27 = vld [vmem:[#allocation4 + $0x148] sm:$0xff]  ;;  %v86_v31 = vld [vmem:[#allocation4 + $0x140] sm:$0xff]  ;;  %v53_v34 = vld [vmem:[#allocation4 + $0x38] sm:$0xff] }
  0x25   :  { %413 = vmatpush3.msra.mxu1 %v89_v19  ;;  %379 = vmatprep.subr.mxu0 %v72_v20  ;;  %v85_v35 = vld [vmem:[#allocation4 + $0x138] sm:$0xff]  ;;  %v68_v36 = vld [vmem:[#allocation4 + $0xb0] sm:$0xff]  ;;  %v67_v40 = vld [vmem:[#allocation4 + $0xa8] sm:$0xff] }
  0x26   :  { %414 = vmatprep.subr.mxu1 %v104_v21  ;;  %380 = vmatpush3.msra.mxu0 %v56_v22  ;;  %v100_v37 = vld [vmem:[#allocation4 + $0x1b0] sm:$0xff]  ;;  %v99_v41 = vld [vmem:[#allocation4 + $0x1a8] sm:$0xff]  ;;  %v66_v44 = vld [vmem:[#allocation4 + $0xa0] sm:$0xff] }
  0x27   :  { %415 = vmatpush3.msra.mxu1 %v88_v23  ;;  %381 = vmatprep.subr.mxu0 %v71_v24  ;;  %v52_v38 = vld [vmem:[#allocation4 + $0x30] sm:$0xff]  ;;  %v51_v42 = vld [vmem:[#allocation4 + $0x28] sm:$0xff]  ;;  %v98_v45 = vld [vmem:[#allocation4 + $0x1a0] sm:$0xff] }
  0x28   :  { %416 = vmatprep.subr.mxu1 %v103_v25  ;;  %382 = vmatpush3.msra.mxu0 %v55_v26  ;;  %v84_v39 = vld [vmem:[#allocation4 + $0x130] sm:$0xff]  ;;  %v83_v43 = vld [vmem:[#allocation4 + $0x128] sm:$0xff]  ;;  %v50_v46 = vld [vmem:[#allocation4 + $0x20] sm:$0xff] }
  0x29   :  { %417 = vmatpush3.msra.mxu1 %v87_v27  ;;  %383 = vmatprep.subr.mxu0 %v70_v28  ;;  %v82_v47 = vld [vmem:[#allocation4 + $0x120] sm:$0xff]  ;;  %v65_v48 = vld [vmem:[#allocation4 + $0x98] sm:$0xff]  ;;  %v64_v52 = vld [vmem:[#allocation4 + $0x90] sm:$0xff] }
  0x2a   :  { %418 = vmatprep.subr.mxu1 %v102_v29  ;;  %384 = vmatpush3.msra.mxu0 %v54_v30  ;;  %v97_v49 = vld [vmem:[#allocation4 + $0x198] sm:$0xff]  ;;  %v96_v53 = vld [vmem:[#allocation4 + $0x190] sm:$0xff]  ;;  %v63_v56 = vld [vmem:[#allocation4 + $0x88] sm:$0xff] }
  0x2b   :  { %419 = vmatpush3.msra.mxu1 %v86_v31  ;;  %385 = vmatprep.subr.mxu0 %v69_v32  ;;  %v49_v50 = vld [vmem:[#allocation4 + $0x18] sm:$0xff]  ;;  %v48_v54 = vld [vmem:[#allocation4 + $0x10] sm:$0xff]  ;;  %v95_v57 = vld [vmem:[#allocation4 + $0x188] sm:$0xff] }
  0x2c   :  { %420 = vmatprep.subr.mxu1 %v101_v33  ;;  %386 = vmatpush3.msra.mxu0 %v53_v34  ;;  %v81_v51 = vld [vmem:[#allocation4 + $0x118] sm:$0xff]  ;;  %v80_v55 = vld [vmem:[#allocation4 + $0x110] sm:$0xff]  ;;  %v47_v58 = vld [vmem:[#allocation4 + $0x8] sm:$0xff] }
  0x2d   :  { %421 = vmatpush3.msra.mxu1 %v85_v35  ;;  %387 = vmatprep.subr.mxu0 %v68_v36  ;;  %v79_v59 = vld [vmem:[#allocation4 + $0x108] sm:$0xff]  ;;  %v62_v60 = vld [vmem:[#allocation4 + $0x80] sm:$0xff]  ;;  %v41_v63 = vld [vmem:[#allocation2 + $0x8] sm:$0xff] }
  0x2e   :  { %422 = vmatprep.subr.mxu1 %v100_v37  ;;  %388 = vmatpush3.msra.mxu0 %v52_v38  ;;  %v94_v61 = vld [vmem:[#allocation4 + $0x180] sm:$0xff]  ;;  %v43_v1 = vld [vmem:[#allocation2 + $0x18] sm:$0xff]  ;;  %v40_v2 = vld [vmem:[#allocation2] sm:$0xff] }
  0x2f   :  { %423 = vmatpush3.msra.mxu1 %v84_v39  ;;  %389 = vmatprep.subr.mxu0 %v67_v40  ;;  %v46_v62 = vld [vmem:[#allocation4] sm:$0xff]  ;;  %v141_v4 = vld [vmem:[#allocation4 + $0x2f8] sm:$0xff]  ;;  %v140_v7 = vld [vmem:[#allocation4 + $0x2f0] sm:$0xff] }
  0x30   :  { %424 = vmatprep.subr.mxu1 %v99_v41  ;;  %390 = vmatpush3.msra.mxu0 %v51_v42  ;;  %v78_v0 = vld [vmem:[#allocation4 + $0x100] sm:$0xff]  ;;  %v125_v5 = vld [vmem:[#allocation4 + $0x278] sm:$0xff]  ;;  %v124_v8 = vld [vmem:[#allocation4 + $0x270] sm:$0xff] }
  0x31   :  { %425 = vmatpush3.msra.mxu1 %v83_v43  ;;  %391 = vmatprep.subr.mxu0 %v66_v44  ;;  %v42_v3 = vld [vmem:[#allocation2 + $0x10] sm:$0xff]  ;;  %v45_v6 = vld [vmem:[#allocation2 + $0x28] sm:$0xff]  ;;  %v139_v9 = vld [vmem:[#allocation4 + $0x2e8] sm:$0xff] }
  0x32   :  { %426 = vmatprep.subr.mxu1 %v98_v45  ;;  %392 = vmatpush3.msra.mxu0 %v50_v46  ;;  %v123_v10 = vld [vmem:[#allocation4 + $0x268] sm:$0xff]  ;;  %v138_v11 = vld [vmem:[#allocation4 + $0x2e0] sm:$0xff]  ;;  %v137_v13 = vld [vmem:[#allocation4 + $0x2d8] sm:$0xff] }
  0x33   :  { %427 = vmatpush3.msra.mxu1 %v82_v47  ;;  %393 = vmatprep.subr.mxu0 %v65_v48  ;;  %v122_v12 = vld [vmem:[#allocation4 + $0x260] sm:$0xff]  ;;  %v121_v14 = vld [vmem:[#allocation4 + $0x258] sm:$0xff]  ;;  %v136_v15 = vld [vmem:[#allocation4 + $0x2d0] sm:$0xff] }
  0x34   :  { %428 = vmatprep.subr.mxu1 %v97_v49  ;;  %394 = vmatpush3.msra.mxu0 %v49_v50  ;;  %v120_v16 = vld [vmem:[#allocation4 + $0x250] sm:$0xff]  ;;  %v135_v17 = vld [vmem:[#allocation4 + $0x2c8] sm:$0xff]  ;;  %v134_v19 = vld [vmem:[#allocation4 + $0x2c0] sm:$0xff] }
  0x35   :  { %429 = vmatpush3.msra.mxu1 %v81_v51  ;;  %395 = vmatprep.subr.mxu0 %v64_v52  ;;  %v119_v18 = vld [vmem:[#allocation4 + $0x248] sm:$0xff]  ;;  %v118_v20 = vld [vmem:[#allocation4 + $0x240] sm:$0xff]  ;;  %v133_v21 = vld [vmem:[#allocation4 + $0x2b8] sm:$0xff] }
  0x36   :  { %430 = vmatprep.subr.mxu1 %v96_v53  ;;  %396 = vmatpush3.msra.mxu0 %v48_v54  ;;  %v117_v22 = vld [vmem:[#allocation4 + $0x238] sm:$0xff]  ;;  %v132_v23 = vld [vmem:[#allocation4 + $0x2b0] sm:$0xff]  ;;  %v131_v25 = vld [vmem:[#allocation4 + $0x2a8] sm:$0xff] }
  0x37   :  { %431 = vmatpush3.msra.mxu1 %v80_v55  ;;  %397 = vmatprep.subr.mxu0 %v63_v56  ;;  %v116_v24 = vld [vmem:[#allocation4 + $0x230] sm:$0xff]  ;;  %v115_v26 = vld [vmem:[#allocation4 + $0x228] sm:$0xff]  ;;  %v130_v27 = vld [vmem:[#allocation4 + $0x2a0] sm:$0xff] }
  0x38   :  { %432 = vmatprep.subr.mxu1 %v95_v57  ;;  %398 = vmatpush3.msra.mxu0 %v47_v58  ;;  %v114_v28 = vld [vmem:[#allocation4 + $0x220] sm:$0xff]  ;;  %v129_v29 = vld [vmem:[#allocation4 + $0x298] sm:$0xff]  ;;  %v128_v31 = vld [vmem:[#allocation4 + $0x290] sm:$0xff] }
  0x39   :  { %433 = vmatpush3.msra.mxu1 %v79_v59  ;;  %399 = vmatprep.subr.mxu0 %v62_v60  ;;  %v113_v30 = vld [vmem:[#allocation4 + $0x218] sm:$0xff]  ;;  %v112_v32 = vld [vmem:[#allocation4 + $0x210] sm:$0xff]  ;;  %v127_v33 = vld [vmem:[#allocation4 + $0x288] sm:$0xff] }
  0x3a   :  { %434 = vmatprep.subr.mxu1 %v94_v61  ;;  %400 = vmatpush3.msra.mxu0 %v46_v62  ;;  %v111_v34 = vld [vmem:[#allocation4 + $0x208] sm:$0xff]  ;;  %v126_v35 = vld [vmem:[#allocation4 + $0x280] sm:$0xff]  ;;  %v44_v37 = vld [vmem:[#allocation2 + $0x20] sm:$0xff] }
  0x3b   :  { %206 = vmatprep.mubr.f32.mxu0 %v41_v63  ;;  %435 = vmatpush3.msra.mxu1 %v78_v0  ;;  %v110_v36 = vld [vmem:[#allocation4 + $0x200] sm:$0xff]  ;;  %v368_v48 = vld [vmem:[%s560_s2] ss:$0 sm:$0xff] }
  0x3c   :  { %276 = vmatprep.mubr.f32.mxu1 %v43_v1  ;;  %207 = vmatmul.mubr.f32.vlgmr.msra.gmra.mxu0 %v40_v2 }
  0x3d   :  { %277 = vmatmul.mubr.f32.vlgmr.msra.gmra.mxu1 %v42_v3  ;;  %439 = vmatprep.subr.mxu0 %v141_v4 }
  0x3e   :  { %346 = vmatprep.mubr.f32.mxu0 %v45_v6  ;;  %440 = vmatpush3.msra.mxu0 %v125_v5 }
  0x3f   :  { %441 = vmatprep.subr.mxu0 %v140_v7 }
  0x40   :  { %442 = vmatpush3.msra.mxu0 %v124_v8 }
  0x41   :  { %443 = vmatprep.subr.mxu0 %v139_v9 }
  0x42   :  { %444 = vmatpush3.msra.mxu0 %v123_v10 }
  0x43   :  { %445 = vmatprep.subr.mxu0 %v138_v11 }
  0x44   :  { %446 = vmatpush3.msra.mxu0 %v122_v12 }
  0x45   :  { %447 = vmatprep.subr.mxu0 %v137_v13 }
  0x46   :  { %448 = vmatpush3.msra.mxu0 %v121_v14 }
  0x47   :  { %449 = vmatprep.subr.mxu0 %v136_v15 }
  0x48   :  { %450 = vmatpush3.msra.mxu0 %v120_v16 }
  0x49   :  { %451 = vmatprep.subr.mxu0 %v135_v17 }
  0x4a   :  { %452 = vmatpush3.msra.mxu0 %v119_v18 }
  0x4b   :  { %453 = vmatprep.subr.mxu0 %v134_v19 }
  0x4c   :  { %454 = vmatpush3.msra.mxu0 %v118_v20 }
  0x4d   :  { %455 = vmatprep.subr.mxu0 %v133_v21 }
  0x4e   :  { %456 = vmatpush3.msra.mxu0 %v117_v22 }
  0x4f   :  { %457 = vmatprep.subr.mxu0 %v132_v23 }
  0x50   :  { %458 = vmatpush3.msra.mxu0 %v116_v24 }
  0x51   :  { %459 = vmatprep.subr.mxu0 %v131_v25 }
  0x52   :  { %460 = vmatpush3.msra.mxu0 %v115_v26 }
  0x53   :  { %461 = vmatprep.subr.mxu0 %v130_v27 }
  0x54   :  { %462 = vmatpush3.msra.mxu0 %v114_v28 }
  0x55   :  { %463 = vmatprep.subr.mxu0 %v129_v29 }
  0x56   :  { %464 = vmatpush3.msra.mxu0 %v113_v30 }
  0x57   :  { %465 = vmatprep.subr.mxu0 %v128_v31 }
  0x58   :  { %466 = vmatpush3.msra.mxu0 %v112_v32 }
  0x59   :  { %467 = vmatprep.subr.mxu0 %v127_v33 }
  0x5a   :  { %468 = vmatpush3.msra.mxu0 %v111_v34 }
  0x5b   :  { %469 = vmatprep.subr.mxu0 %v126_v35 }
  0x5c   :  { %470 = vmatpush3.msra.mxu0 %v110_v36 }
  0x5d   :  { %347 = vmatmul.mubr.f32.vlgmr.msra.gmra.mxu0 %v44_v37 }
  0xfc   :  { %v401_v38 = vpop.f32.mrf.mxu0 }
  0xfd   :  { %v436_v39 = vpop.f32.mrf.mxu1 }
  0xfe   :  { %v402_v40 = vpop.f32.mrf.mxu0 }
  0xff   :  { %v437_v41 = vpop.f32.mrf.mxu1  ;;  %v403_v42 = vadd.f32 %v402_v40, %v401_v38 }
 0x100   :  { %v438_v43 = vadd.f32 %v437_v41, %v436_v39 }
 0x102   :  { %v279_v46 = vadd.f32 %v438_v43, %v403_v42 }
 0x11d   :  { %v471_v44 = vpop.f32.mrf.mxu0 }
 0x11f   :  { %v472_v45 = vpop.f32.mrf.mxu0 }
 0x120   :  { %v473_v47 = vadd.f32 %v472_v45, %v471_v44 }
 0x122   :  { %v349_v49 = vadd.f32 %v473_v47, %v279_v46 }
 0x124   :  { %v359_v50 = vadd.f32 %v368_v48, %v349_v49 }
 0x126   :  { %361 = vst.msk [vmem:[%s561_s3] sm:$0xff] %vm360_vm0, %v359_v50 }
 0x127   :  { %366 = vsyncpa [#allocation3], 1 }
 0x128   :  { %367 = vsyncpa [#allocation5], 1 }

</bundles_post_ra>
